<compile_context>
chip_gen: v5e
topology: v5e:2x2
jax: 0.10.0
libtpu: 0.0.40
codegen_flags: <defaults>
</compile_context>

<pallas_src>
import functools

import jax
import jax.numpy as jnp
from jax.experimental import pallas as pl
from jax.experimental.pallas import tpu as pltpu

SIGMA_DATA = 0.5
SIGMA_OFFSET_NOISE = 0.3
CPAD = 8  # frames padded to 8 channels -> sublane-dense (8,128) tiles


def _make_kernel(c_mid, n_cond, seq_len, hw):
    k_obs = n_cond * CPAD

    def kernel(scal_ref, obs_ref, noise_ref, bias_ref,
               w1c_ref, w1n_ref, w2_ref, b2_ref,
               den_ref, loss_ref, work_ref, copy_sem):
        b = pl.program_id(0)

        # Seed the single resident working buffer for this batch element with
        # one DMA straight from HBM (no double-buffered f32 input slab).
        cp = pltpu.make_async_copy(obs_ref.at[b], work_ref, copy_sem)
        cp.start()
        cp.wait()

        # Loop-invariant small operands, read once per batch element.
        w1c = w1c_ref[...]            # (c_mid, k_obs)  bf16
        w1n = w1n_ref[...]            # (c_mid, CPAD)   bf16
        w2 = w2_ref[...]              # (CPAD, c_mid)   bf16
        b2 = b2_ref[...]              # (CPAD, 1)       f32

        def step(t, loss_acc):
            # EDM scalars from SMEM (scalar path, no masked vector loads).
            base = (b * seq_len + t) * 4
            c_in = scal_ref[base]
            c_skip = scal_ref[base + 1]
            c_out = scal_ref[base + 2]
            lscale = scal_ref[base + 3]

            # ---- apply_noise: ground-truth next frame + precombined noise ----
            nxt_row = pl.multiple_of((t + n_cond + 1) * CPAD, CPAD)
            next_obs = work_ref[pl.ds(nxt_row, CPAD), :]          # (CPAD, HW) f32
            noisy = next_obs + noise_ref[0, t].astype(jnp.float32)

            # ---- inner model (stand-in UNet): two accumulating MXU matmuls,
            #      no materialized [cond | noisy] concatenation ----
            cond_row = pl.multiple_of((t + 1) * CPAD, CPAD)
            obs_cond = work_ref[pl.ds(cond_row, k_obs), :].astype(jnp.bfloat16)
            h = (jnp.dot(w1c, obs_cond, preferred_element_type=jnp.float32)
                 + jnp.dot(w1n, (noisy * c_in).astype(jnp.bfloat16),
                           preferred_element_type=jnp.float32)
                 + bias_ref[0, t])                                 # (c_mid, 1)
            h = h * jax.nn.sigmoid(h)                              # SiLU (EUP)
            model_out = jnp.dot(w2, h.astype(jnp.bfloat16),
                                preferred_element_type=jnp.float32) + b2

            # ---- training target + masked-MSE contribution (exact divide) ----
            target = (next_obs - c_skip * noisy) / c_out
            diff = model_out - target
            loss_acc = loss_acc + lscale * jnp.sum(diff * diff)

            # ---- wrap_model_output: clamp + uint8 (trunc) quantize roundtrip --
            d = jnp.clip(c_skip * noisy + c_out * model_out, -1.0, 1.0)
            d = jnp.floor((d + 1.0) * 0.5 * 255.0) / 255.0 * 2.0 - 1.0

            # Reference writes the denoised frame at index n + i (not n+i+1).
            wr_row = pl.multiple_of((t + n_cond) * CPAD, CPAD)
            work_ref[pl.ds(wr_row, CPAD), :] = d
            den_ref[0, t] = d
            return loss_acc

        loss_val = jax.lax.fori_loop(0, seq_len, step,
                                     jnp.zeros((), jnp.float32))
        # Single store of the per-b loss (vst slot saved on every step).
        loss_ref[...] = jnp.broadcast_to(loss_val, (1, 1, 128))

    return kernel


def denoiser_forward(params, obs_seq, act_seq, mask_padding, key, *,
                     n_cond, loc, scale, sigma_min, sigma_max):
    """Replicates Denoiser.forward over a (B, T, C, H, W) observation batch."""
    B, T, C, H, W = obs_seq.shape
    HW = H * W
    S = T - n_cond - 1                           # seq_length
    C_mid = params["w1a"].shape[0]
    k_obs = n_cond * CPAD

    # ---------------- host-side glue (RNG, embeddings, conditioners) --------
    k1, k2, k3 = jax.random.split(key, 3)
    sigma = jnp.clip(jnp.exp(jax.random.normal(k1, (B, S)) * scale + loc),
                     sigma_min, sigma_max)                           # (B, S)
    eps = jax.random.normal(k2, (B, S, C, HW))
    off = jax.random.normal(k3, (B, S, C, 1))

    sig2 = sigma ** 2 + SIGMA_OFFSET_NOISE ** 2
    sig_eff = jnp.sqrt(sig2)
    c_in = jax.lax.rsqrt(sig2 + SIGMA_DATA ** 2)
    c_skip = SIGMA_DATA ** 2 / (sig2 + SIGMA_DATA ** 2)
    c_out = sig_eff * jnp.sqrt(c_skip)
    c_noise = jnp.log(sig_eff) / 4.0

    # action windows act[:, i+1 : n+i+1], embedded + averaged (stand-in cond).
    idx = jnp.arange(S)[:, None] + 1 + jnp.arange(n_cond)[None, :]   # (S, n)
    act_win = act_seq[:, idx]                                        # (B, S, n)
    act_vec = params["act_emb"][act_win].mean(axis=2)                # (B,S,C_mid)

    # fused per-step bias: b1 + noise_b + noise_w*c_noise + act embedding
    bias1 = (params["b1"][:, 0] + params["noise_b"][:, 0]
             + params["noise_w"][:, 0] * c_noise[..., None] + act_vec)
    bias1 = bias1[..., None].astype(jnp.float32)                     # (B,S,C_mid,1)

    # masked-MSE weight per (b, step): mask / (num_masked_at_step * C*H*W)
    mask = mask_padding[:, n_cond + 1:n_cond + 1 + S].astype(jnp.float32)
    num_masked = jnp.maximum(mask.sum(axis=0), 1.0)
    lscale = mask / (num_masked[None, :] * float(C * H * W))

    # 4 EDM scalars per (b,t), flattened -> SMEM scalar path in the kernel.
    scal = jnp.stack([c_in, c_skip, c_out, lscale], axis=-1)
    scal = scal.reshape(-1).astype(jnp.float32)                      # (B*S*4,)

    # precombined apply_noise term (eps*sigma + offset noise), bf16 stream.
    noise = eps * sigma[:, :, None, None] + SIGMA_OFFSET_NOISE * off
    noise_p = jnp.zeros((B, S, CPAD, HW), jnp.bfloat16
                        ).at[:, :, :C].set(noise.astype(jnp.bfloat16))

    # channel-padded frame history, flattened to (T*CPAD, HW) per b so the
    # kernel can slice frames on the sublane axis without reshapes.
    obs_p = jnp.zeros((B, T, CPAD, HW), jnp.float32
                      ).at[:, :, :C].set(obs_seq.reshape(B, T, C, HW))
    obs_p = obs_p.reshape(B, T * CPAD, HW)

    # weights: fold 1/sigma_data into the conditioning branch, pad channels,
    # bf16 for the MXU.  Cond / noise branches kept separate (no concat).
    w1c = (params["w1b"] / SIGMA_DATA).reshape(C_mid, n_cond, C)
    w1c = jnp.zeros((C_mid, n_cond, CPAD), jnp.float32).at[:, :, :C].set(w1c)
    w1c = w1c.reshape(C_mid, k_obs).astype(jnp.bfloat16)
    w1n = jnp.zeros((C_mid, CPAD), jnp.float32
                    ).at[:, :C].set(params["w1a"]).astype(jnp.bfloat16)
    w2 = jnp.zeros((CPAD, C_mid), jnp.float32
                   ).at[:C].set(params["w2"]).astype(jnp.bfloat16)
    b2 = jnp.zeros((CPAD, 1), jnp.float32).at[:C].set(params["b2"])

    kernel = _make_kernel(C_mid, n_cond, S, HW)
    per_b4 = lambda b: (b, 0, 0, 0)
    whole2 = lambda b: (0, 0)

    flops = 2 * B * S * HW * C_mid * (k_obs + 2 * CPAD)
    transcendentals = B * S * C_mid * HW
    bytes_accessed = (obs_p.size * 4 + noise_p.size * 2 + bias1.size * 4
                      + scal.size * 4
                      + 2 * (w1c.size + w1n.size + w2.size) + b2.size * 4
                      + B * S * CPAD * HW * 4 + B * 128 * 4)

    # explicit VMEM budget (v5e default scoped limit is 16 MiB; v7x physical
    # VMEM is 64 MiB) — derived from the actual resident/double-buffered blocks.
    vmem_need = (4 * T * CPAD * HW                    # working scratch (f32)
                 + 2 * 2 * S * CPAD * HW              # noise bf16, dbl-buffered
                 + 2 * 4 * S * CPAD * HW              # denoised out, dbl-buffered
                 + 2 * 4 * S * C_mid * 128            # bias block (lane-padded)
                 + 2 * (w1c.size + w1n.size + w2.size)
                 + 4 * CPAD * 128 + 2 * 4 * 128)
    vmem_limit = int(min(64 << 20, max(2 * vmem_need, 8 << 20)))

    den_p, loss_buf = pl.pallas_call(
        kernel,
        out_shape=(jax.ShapeDtypeStruct((B, S, CPAD, HW), jnp.float32),
                   jax.ShapeDtypeStruct((B, 1, 128), jnp.float32)),
        grid_spec=pltpu.PrefetchScalarGridSpec(
            num_scalar_prefetch=0,
            grid=(B,),
            in_specs=[
                pl.BlockSpec(memory_space=pltpu.MemorySpace.SMEM),   # EDM scalars
                pl.BlockSpec(memory_space=pl.ANY),                   # all_obs (HBM)
                pl.BlockSpec((1, S, CPAD, HW), per_b4),              # noise (bf16)
                pl.BlockSpec((1, S, C_mid, 1), per_b4),              # fused bias
                pl.BlockSpec(w1c.shape, whole2),                     # W1 cond (bf16)
                pl.BlockSpec(w1n.shape, whole2),                     # W1 noise (bf16)
                pl.BlockSpec(w2.shape, whole2),                      # W2 (bf16)
                pl.BlockSpec(b2.shape, whole2),                      # b2
            ],
            out_specs=[
                pl.BlockSpec((1, S, CPAD, HW), per_b4),              # denoised frames
                pl.BlockSpec((1, 1, 128), lambda b: (b, 0, 0)),      # per-b loss
            ],
            scratch_shapes=[
                pltpu.VMEM((T * CPAD, HW), jnp.float32),             # resident all_obs
                pltpu.SemaphoreType.DMA,
            ],
        ),
        compiler_params=pltpu.CompilerParams(
            dimension_semantics=("parallel",),
            vmem_limit_bytes=vmem_limit),
        cost_estimate=pl.CostEstimate(flops=flops,
                                      transcendentals=transcendentals,
                                      bytes_accessed=bytes_accessed),
    )(scal, obs_p, noise_p, bias1, w1c, w1n, w2, b2)

    loss = loss_buf[:, 0, 0].sum() / S
    den = den_p[:, :, :C, :].reshape(B, S, C, H, W)
    all_obs = obs_seq.at[:, n_cond:n_cond + S].set(den)
    return loss, all_obs


def init_params(key, img_c, n_cond, c_mid, num_actions):
    ks = jax.random.split(key, 5)

    def w(k, shape, s=0.1):
        return (jax.random.normal(k, shape) * s).astype(jnp.float32)

    return {
        "w1a": w(ks[0], (c_mid, img_c)),
        "w1b": w(ks[1], (c_mid, n_cond * img_c)),
        "b1": jnp.zeros((c_mid, 1), jnp.float32),
        "noise_w": w(ks[2], (c_mid, 1)),
        "noise_b": jnp.zeros((c_mid, 1), jnp.float32),
        "w2": w(ks[3], (img_c, c_mid)),
        "b2": jnp.zeros((img_c, 1), jnp.float32),
        "act_emb": w(ks[4], (num_actions, c_mid)),
    }


if __name__ == "__main__":
    key = jax.random.PRNGKey(0)
    B, T, C, H, W = 2, 8, 4, 16, 16      # T = n_cond + 1 + seq_length
    n_cond = 4                           # num_steps_conditioning
    c_mid = 32
    num_actions = 8

    kp, ko, ka, kf = jax.random.split(key, 4)
    params = init_params(kp, C, n_cond, c_mid, num_actions)
    obs_seq = jnp.clip(jax.random.normal(ko, (B, T, C, H, W)),
                       -1.0, 1.0).astype(jnp.float32)
    act_seq = jax.random.randint(ka, (B, T), 0, num_actions)
    mask_padding = jnp.ones((B, T), dtype=bool)

    fwd = jax.jit(functools.partial(
        denoiser_forward, n_cond=n_cond, loc=-0.4, scale=1.2,
        sigma_min=2e-3, sigma_max=20.0))
    loss, all_obs = fwd(params, obs_seq, act_seq, mask_padding, kf)
    jax.block_until_ready((loss, all_obs))
    assert jnp.isfinite(loss)
    assert all_obs.shape == obs_seq.shape
    print("KERNEL_OK")
</pallas_src>

<mosaic_0001>
module attributes {stable_mosaic.version = 11 : i64} {
  func.func @kernel(%arg0: i32, %arg1: memref<24xf32, #tpu.memory_space<smem>>, %arg2: memref<2x64x256xf32, #tpu.memory_space<any>>, %arg3: memref<1x3x8x256xbf16, #tpu.memory_space<vmem>>, %arg4: memref<1x3x32x1xf32, #tpu.memory_space<vmem>>, %arg5: memref<32x32xbf16, #tpu.memory_space<vmem>>, %arg6: memref<32x8xbf16, #tpu.memory_space<vmem>>, %arg7: memref<8x32xbf16, #tpu.memory_space<vmem>>, %arg8: memref<8x1xf32, #tpu.memory_space<vmem>>, %arg9: memref<1x3x8x256xf32, #tpu.memory_space<vmem>>, %arg10: memref<1x1x128xf32, #tpu.memory_space<vmem>>, %arg11: memref<64x256xf32, #tpu.memory_space<vmem>>, %arg12: memref<!tpu.dma_semaphore, #tpu.memory_space<semaphore_mem>>) attributes {dimension_semantics = [#tpu.dimension_semantics<parallel>], iteration_bounds = array<i64: 2>, scalar_prefetch = 0 : i64, scratch_operands = 2 : i64, tpu.core_type = #tpu.core_type<tc>, window_params = [{transform_indices = @transform_0, window_bounds = array<i64: 24>}, {}, {transform_indices = @transform_2, window_bounds = array<i64: 1, 3, 8, 256>}, {transform_indices = @transform_3, window_bounds = array<i64: 1, 3, 32, 1>}, {pipeline_mode = #tpu.pipeline_mode<synchronous>, transform_indices = @transform_4, window_bounds = array<i64: 32, 32>}, {pipeline_mode = #tpu.pipeline_mode<synchronous>, transform_indices = @transform_5, window_bounds = array<i64: 32, 8>}, {pipeline_mode = #tpu.pipeline_mode<synchronous>, transform_indices = @transform_6, window_bounds = array<i64: 8, 32>}, {pipeline_mode = #tpu.pipeline_mode<synchronous>, transform_indices = @transform_7, window_bounds = array<i64: 8, 1>}, {transform_indices = @transform_8, window_bounds = array<i64: 1, 3, 8, 256>}, {transform_indices = @transform_9, window_bounds = array<i64: 1, 1, 128>}]} {
    %c0_i32 = arith.constant 0 : i32
    %c0_i32_0 = arith.constant 0 : i32
    %0 = tpu.memref_slice %arg2[%arg0, %c0_i32, %c0_i32_0] : memref<2x64x256xf32, #tpu.memory_space<any>> -> memref<1x64x256xf32, #tpu.memory_space<any>>
    %1 = tpu.memref_squeeze %0 : memref<1x64x256xf32, #tpu.memory_space<any>> -> memref<64x256xf32, #tpu.memory_space<any>>
    tpu.enqueue_dma source(%1 : memref<64x256xf32, #tpu.memory_space<any>>) target(%arg11 : memref<64x256xf32, #tpu.memory_space<vmem>>) target_semaphore(%arg12 : memref<!tpu.dma_semaphore, #tpu.memory_space<semaphore_mem>>)
    %c0_i32_1 = arith.constant 0 : i32
    %c0_i32_2 = arith.constant 0 : i32
    %2 = tpu.memref_slice %arg2[%arg0, %c0_i32_1, %c0_i32_2] : memref<2x64x256xf32, #tpu.memory_space<any>> -> memref<1x64x256xf32, #tpu.memory_space<any>>
    %3 = tpu.memref_squeeze %2 : memref<1x64x256xf32, #tpu.memory_space<any>> -> memref<64x256xf32, #tpu.memory_space<any>>
    tpu.wait_dma2 semaphore(%arg12 : memref<!tpu.dma_semaphore, #tpu.memory_space<semaphore_mem>>) src(%3 : memref<64x256xf32, #tpu.memory_space<any>>) dst(%arg11 : memref<64x256xf32, #tpu.memory_space<vmem>>)
    %c0 = arith.constant 0 : index
    %c0_3 = arith.constant 0 : index
    %4 = vector.load %arg5[%c0, %c0_3] : memref<32x32xbf16, #tpu.memory_space<vmem>>, vector<32x32xbf16>
    %c0_4 = arith.constant 0 : index
    %c0_5 = arith.constant 0 : index
    %5 = vector.load %arg6[%c0_4, %c0_5] : memref<32x8xbf16, #tpu.memory_space<vmem>>, vector<32x8xbf16>
    %c0_6 = arith.constant 0 : index
    %c0_7 = arith.constant 0 : index
    %6 = vector.load %arg7[%c0_6, %c0_7] : memref<8x32xbf16, #tpu.memory_space<vmem>>, vector<8x32xbf16>
    %c0_8 = arith.constant 0 : index
    %c0_9 = arith.constant 0 : index
    %7 = vector.load %arg8[%c0_8, %c0_9] : memref<8x1xf32, #tpu.memory_space<vmem>>, vector<8x1xf32>
    %cst = arith.constant 0.000000e+00 : f32
    %c0_i32_10 = arith.constant 0 : i32
    %c3_i32 = arith.constant 3 : i32
    %8 = arith.addi %c0_i32_10, %c3_i32 : i32
    %c1_i32 = arith.constant 1 : i32
    %9 = scf.for %arg13 = %c0_i32_10 to %8 step %c1_i32 iter_args(%arg14 = %cst) -> (f32)  : i32 {
      %c3_i32_15 = arith.constant 3 : i32
      %12 = arith.muli %arg0, %c3_i32_15 : i32
      %13 = arith.addi %12, %arg13 : i32
      %c4_i32 = arith.constant 4 : i32
      %14 = arith.muli %13, %c4_i32 : i32
      %15 = arith.index_cast %14 : i32 to index
      %16 = memref.load %arg1[%15] : memref<24xf32, #tpu.memory_space<smem>>
      %c1_i32_16 = arith.constant 1 : i32
      %17 = arith.addi %14, %c1_i32_16 : i32
      %18 = arith.index_cast %17 : i32 to index
      %19 = memref.load %arg1[%18] : memref<24xf32, #tpu.memory_space<smem>>
      %c2_i32 = arith.constant 2 : i32
      %20 = arith.addi %14, %c2_i32 : i32
      %21 = arith.index_cast %20 : i32 to index
      %22 = memref.load %arg1[%21] : memref<24xf32, #tpu.memory_space<smem>>
      %c3_i32_17 = arith.constant 3 : i32
      %23 = arith.addi %14, %c3_i32_17 : i32
      %24 = arith.index_cast %23 : i32 to index
      %25 = memref.load %arg1[%24] : memref<24xf32, #tpu.memory_space<smem>>
      %c4_i32_18 = arith.constant 4 : i32
      %26 = arith.addi %arg13, %c4_i32_18 : i32
      %c1_i32_19 = arith.constant 1 : i32
      %27 = arith.addi %26, %c1_i32_19 : i32
      %c8_i32 = arith.constant 8 : i32
      %28 = arith.muli %27, %c8_i32 : i32
      %29 = tpu.assume_multiple %28, 8 : i32
      %30 = arith.index_cast %29 : i32 to index
      %c0_20 = arith.constant 0 : index
      %31 = vector.load %arg11[%30, %c0_20] : memref<64x256xf32, #tpu.memory_space<vmem>>, vector<8x256xf32>
      %c0_21 = arith.constant 0 : index
      %32 = arith.index_cast %arg13 : i32 to index
      %c0_22 = arith.constant 0 : index
      %c0_23 = arith.constant 0 : index
      %33 = vector.load %arg3[%c0_21, %32, %c0_22, %c0_23] : memref<1x3x8x256xbf16, #tpu.memory_space<vmem>>, vector<1x1x8x256xbf16>
      %34 = vector.shape_cast %33 : vector<1x1x8x256xbf16> to vector<8x256xbf16>
      %35 = arith.extf %34 : vector<8x256xbf16> to vector<8x256xf32>
      %36 = arith.addf %31, %35 : vector<8x256xf32>
      %c1_i32_24 = arith.constant 1 : i32
      %37 = arith.addi %arg13, %c1_i32_24 : i32
      %c8_i32_25 = arith.constant 8 : i32
      %38 = arith.muli %37, %c8_i32_25 : i32
      %39 = tpu.assume_multiple %38, 8 : i32
      %40 = arith.index_cast %39 : i32 to index
      %c0_26 = arith.constant 0 : index
      %41 = vector.load %arg11[%40, %c0_26] : memref<64x256xf32, #tpu.memory_space<vmem>>, vector<32x256xf32>
      %42 = arith.truncf %41 : vector<32x256xf32> to vector<32x256xbf16>
      %cst_27 = arith.constant dense<0.000000e+00> : vector<32x256xf32>
      %43 = tpu.matmul %4, %42, %cst_27 {dimension_numbers = #tpu.dot_dimension_numbers<[1], [0], [0], [1], [0, 0, 1, 1], [], []>} : vector<32x32xbf16>, vector<32x256xbf16>, vector<32x256xf32> -> vector<32x256xf32>
      %44 = vector.broadcast %16 : f32 to vector<8x256xf32>
      %45 = arith.mulf %36, %44 : vector<8x256xf32>
      %46 = arith.truncf %45 : vector<8x256xf32> to vector<8x256xbf16>
      %cst_28 = arith.constant dense<0.000000e+00> : vector<32x256xf32>
      %47 = tpu.matmul %5, %46, %cst_28 {dimension_numbers = #tpu.dot_dimension_numbers<[1], [0], [0], [1], [0, 0, 1, 1], [], []>} : vector<32x8xbf16>, vector<8x256xbf16>, vector<32x256xf32> -> vector<32x256xf32>
      %48 = arith.addf %43, %47 : vector<32x256xf32>
      %c0_29 = arith.constant 0 : index
      %49 = arith.index_cast %arg13 : i32 to index
      %c0_30 = arith.constant 0 : index
      %c0_31 = arith.constant 0 : index
      %50 = vector.load %arg4[%c0_29, %49, %c0_30, %c0_31] : memref<1x3x32x1xf32, #tpu.memory_space<vmem>>, vector<1x1x32x1xf32>
      %51 = vector.shape_cast %50 : vector<1x1x32x1xf32> to vector<32x1xf32>
      %52 = vector.broadcast %51 : vector<32x1xf32> to vector<32x256xf32>
      %53 = arith.addf %48, %52 : vector<32x256xf32>
      %54 = arith.negf %53 : vector<32x256xf32>
      %55 = math.exp %54 : vector<32x256xf32>
      %cst_32 = arith.constant 1.000000e+00 : f32
      %56 = vector.broadcast %cst_32 : f32 to vector<32x256xf32>
      %57 = arith.addf %56, %55 : vector<32x256xf32>
      %58 = arith.divf %56, %57 : vector<32x256xf32>
      %59 = arith.mulf %53, %58 : vector<32x256xf32>
      %60 = arith.truncf %59 : vector<32x256xf32> to vector<32x256xbf16>
      %cst_33 = arith.constant dense<0.000000e+00> : vector<8x256xf32>
      %61 = tpu.matmul %6, %60, %cst_33 {dimension_numbers = #tpu.dot_dimension_numbers<[1], [0], [0], [1], [0, 0, 1, 1], [], []>} : vector<8x32xbf16>, vector<32x256xbf16>, vector<8x256xf32> -> vector<8x256xf32>
      %62 = vector.broadcast %7 : vector<8x1xf32> to vector<8x256xf32>
      %63 = arith.addf %61, %62 : vector<8x256xf32>
      %64 = vector.broadcast %19 : f32 to vector<8x256xf32>
      %65 = arith.mulf %64, %36 : vector<8x256xf32>
      %66 = arith.subf %31, %65 : vector<8x256xf32>
      %67 = vector.broadcast %22 : f32 to vector<8x256xf32>
      %68 = arith.divf %66, %67 : vector<8x256xf32>
      %69 = arith.subf %63, %68 : vector<8x256xf32>
      %70 = arith.mulf %69, %69 : vector<8x256xf32>
      %71 = vector.shape_cast %70 : vector<8x256xf32> to vector<1x8x256xf32>
      %cst_34 = arith.constant dense<0.000000e+00> : vector<1xf32>
      %72 = vector.multi_reduction <add>, %71, %cst_34 [1, 2] : vector<1x8x256xf32> to vector<1xf32>
      %73 = vector.shape_cast %72 : vector<1xf32> to vector<1x1x1xf32>
      %74 = vector.extract %73[0, 0, 0] : f32 from vector<1x1x1xf32>
      %75 = arith.mulf %25, %74 : f32
      %76 = arith.addf %arg14, %75 : f32
      %77 = vector.broadcast %19 : f32 to vector<8x256xf32>
      %78 = arith.mulf %77, %36 : vector<8x256xf32>
      %79 = vector.broadcast %22 : f32 to vector<8x256xf32>
      %80 = arith.mulf %79, %63 : vector<8x256xf32>
      %81 = arith.addf %78, %80 : vector<8x256xf32>
      %cst_35 = arith.constant -1.000000e+00 : f32
      %cst_36 = arith.constant 1.000000e+00 : f32
      %82 = vector.broadcast %cst_35 : f32 to vector<8x256xf32>
      %83 = arith.maximumf %82, %81 : vector<8x256xf32>
      %84 = vector.broadcast %cst_36 : f32 to vector<8x256xf32>
      %85 = arith.minimumf %84, %83 : vector<8x256xf32>
      %cst_37 = arith.constant 1.000000e+00 : f32
      %86 = vector.broadcast %cst_37 : f32 to vector<8x256xf32>
      %87 = arith.addf %85, %86 : vector<8x256xf32>
      %cst_38 = arith.constant 5.000000e-01 : f32
      %88 = vector.broadcast %cst_38 : f32 to vector<8x256xf32>
      %89 = arith.mulf %87, %88 : vector<8x256xf32>
      %cst_39 = arith.constant 2.550000e+02 : f32
      %90 = vector.broadcast %cst_39 : f32 to vector<8x256xf32>
      %91 = arith.mulf %89, %90 : vector<8x256xf32>
      %92 = math.floor %91 : vector<8x256xf32>
      %cst_40 = arith.constant 2.550000e+02 : f32
      %93 = vector.broadcast %cst_40 : f32 to vector<8x256xf32>
      %94 = arith.divf %92, %93 : vector<8x256xf32>
      %cst_41 = arith.constant 2.000000e+00 : f32
      %95 = vector.broadcast %cst_41 : f32 to vector<8x256xf32>
      %96 = arith.mulf %94, %95 : vector<8x256xf32>
      %cst_42 = arith.constant 1.000000e+00 : f32
      %97 = vector.broadcast %cst_42 : f32 to vector<8x256xf32>
      %98 = arith.subf %96, %97 : vector<8x256xf32>
      %c4_i32_43 = arith.constant 4 : i32
      %99 = arith.addi %arg13, %c4_i32_43 : i32
      %c8_i32_44 = arith.constant 8 : i32
      %100 = arith.muli %99, %c8_i32_44 : i32
      %101 = tpu.assume_multiple %100, 8 : i32
      %102 = arith.index_cast %101 : i32 to index
      %c0_45 = arith.constant 0 : index
      %103 = vector.load %arg11[%102, %c0_45] : memref<64x256xf32, #tpu.memory_space<vmem>>, vector<8x256xf32>
      tpu.vector_store %arg11[%102, %c0_45], %98 {strides = array<i32>} : memref<64x256xf32, #tpu.memory_space<vmem>>, vector<8x256xf32>,
      %c0_46 = arith.constant 0 : index
      %104 = arith.index_cast %arg13 : i32 to index
      %c0_47 = arith.constant 0 : index
      %c0_48 = arith.constant 0 : index
      %105 = vector.load %arg9[%c0_46, %104, %c0_47, %c0_48] : memref<1x3x8x256xf32, #tpu.memory_space<vmem>>, vector<1x1x8x256xf32>
      %106 = vector.shape_cast %105 : vector<1x1x8x256xf32> to vector<8x256xf32>
      %107 = vector.shape_cast %98 : vector<8x256xf32> to vector<1x1x8x256xf32>
      tpu.vector_store %arg9[%c0_46, %104, %c0_47, %c0_48], %107 {strides = array<i32>} : memref<1x3x8x256xf32, #tpu.memory_space<vmem>>, vector<1x1x8x256xf32>,
      scf.yield %76 : f32
    }
    %c3_i32_11 = arith.constant 3 : i32
    %10 = vector.broadcast %9 : f32 to vector<1x1x128xf32>
    %c0_12 = arith.constant 0 : index
    %c0_13 = arith.constant 0 : index
    %c0_14 = arith.constant 0 : index
    %11 = vector.load %arg10[%c0_12, %c0_13, %c0_14] : memref<1x1x128xf32, #tpu.memory_space<vmem>>, vector<1x1x128xf32>
    tpu.vector_store %arg10[%c0_12, %c0_13, %c0_14], %10 {strides = array<i32>} : memref<1x1x128xf32, #tpu.memory_space<vmem>>, vector<1x1x128xf32>,
    return
  }
  func.func @transform_0(%arg0: i32) -> i32 {
    %c0_i32 = arith.constant 0 : i32
    %c0_i32_0 = arith.constant 0 : i32
    return %c0_i32 : i32
  }
  func.func @transform_2(%arg0: i32) -> (i32, i32, i32, i32) {
    %c0_i32 = arith.constant 0 : i32
    %c0_i32_0 = arith.constant 0 : i32
    %c0_i32_1 = arith.constant 0 : i32
    %c0_i32_2 = arith.constant 0 : i32
    return %arg0, %c0_i32, %c0_i32_0, %c0_i32_1 : i32, i32, i32, i32
  }
  func.func @transform_3(%arg0: i32) -> (i32, i32, i32, i32) {
    %c0_i32 = arith.constant 0 : i32
    %c0_i32_0 = arith.constant 0 : i32
    %c0_i32_1 = arith.constant 0 : i32
    %c0_i32_2 = arith.constant 0 : i32
    return %arg0, %c0_i32, %c0_i32_0, %c0_i32_1 : i32, i32, i32, i32
  }
  func.func @transform_4(%arg0: i32) -> (i32, i32) {
    %c0_i32 = arith.constant 0 : i32
    %c0_i32_0 = arith.constant 0 : i32
    %c0_i32_1 = arith.constant 0 : i32
    return %c0_i32, %c0_i32_0 : i32, i32
  }
  func.func @transform_5(%arg0: i32) -> (i32, i32) {
    %c0_i32 = arith.constant 0 : i32
    %c0_i32_0 = arith.constant 0 : i32
    %c0_i32_1 = arith.constant 0 : i32
    return %c0_i32, %c0_i32_0 : i32, i32
  }
  func.func @transform_6(%arg0: i32) -> (i32, i32) {
    %c0_i32 = arith.constant 0 : i32
    %c0_i32_0 = arith.constant 0 : i32
    %c0_i32_1 = arith.constant 0 : i32
    return %c0_i32, %c0_i32_0 : i32, i32
  }
  func.func @transform_7(%arg0: i32) -> (i32, i32) {
    %c0_i32 = arith.constant 0 : i32
    %c0_i32_0 = arith.constant 0 : i32
    %c0_i32_1 = arith.constant 0 : i32
    return %c0_i32, %c0_i32_0 : i32, i32
  }
  func.func @transform_8(%arg0: i32) -> (i32, i32, i32, i32) {
    %c0_i32 = arith.constant 0 : i32
    %c0_i32_0 = arith.constant 0 : i32
    %c0_i32_1 = arith.constant 0 : i32
    %c0_i32_2 = arith.constant 0 : i32
    return %arg0, %c0_i32, %c0_i32_0, %c0_i32_1 : i32, i32, i32, i32
  }
  func.func @transform_9(%arg0: i32) -> (i32, i32, i32) {
    %c0_i32 = arith.constant 0 : i32
    %c0_i32_0 = arith.constant 0 : i32
    %c0_i32_1 = arith.constant 0 : i32
    return %arg0, %c0_i32, %c0_i32_0 : i32, i32, i32
  }
}

</mosaic_0001>

<bundles_post_ra>
// kernel: denoiser_forward.3
= control target key start
LH: loop header
LB: loop body
LE: loop exit
PB: predicated region body
PF: predicated region fallthrough
CT: control target
= control target key end

     0   :  { %15 = vsyncpa [#allocation5], 0  ;;  %s1303_s30 = smov 0   ;;  %s1741_s0 = inlined_call_operand.vmem [shape: f32[24], index: 0, kind: input, shape index: {}]   ;;  %s1742_s1 = inlined_call_operand.vmem [shape: f32[2,64,256], index: 1, kind: input, shape index: {}]   ;;  %s1743_s2 = inlined_call_operand.vmem [shape: bf16[2,3,8,256], index: 2, kind: input, shape index: {}]   ;;  %s1744_s3 = inlined_call_operand.vmem [shape: f32[2,3,32,1], index: 3, kind: input, shape index: {}]   ;;  %s1745_s4 = inlined_call_operand.vmem [shape: bf16[32,32], index: 4, kind: input, shape index: {}]   ;;  %s1746_s5 = inlined_call_operand.vmem [shape: bf16[32,8], index: 5, kind: input, shape index: {}]   ;;  %s1747_s6 = inlined_call_operand.vmem [shape: bf16[8,32], index: 6, kind: input, shape index: {}]   ;;  %s1748_s7 = inlined_call_operand.vmem [shape: f32[8,1], index: 7, kind: input, shape index: {}]   ;;  %s1749_s8 = inlined_call_operand.vmem [shape: f32[2,3,8,256], index: 8, kind: output, shape index: {0}]   ;;  %s1750_s9 = inlined_call_operand.vmem [shape: f32[2,1,128], index: 9, kind: output, shape index: {1}]  }
   0x1 LB: > { %s1309_s10 = sadd.s32 4294967295, %s1240_s30   ;;  %p1043_p0 = scmp.ge.s32.totalorder %s1240_s30, 1  ;;  %s1240_s30 = sphi %s1303_s30, %s21_s30  }
   0x2   : > { %p235_p1 = scmp.lt.s32.totalorder %s1240_s30, 3  ;;  %s247_s13 = sshll.u32 %s1741_s0, 4  ;;  %s248_s13 = int_to_ptr.vmem [resolvable:$true] %s247_s13 }
   0x3   : > { %p1137_p3 = scmp.eq.s32.totalorder %s1309_s10, 0  ;;  %s1250_s14 = smov [#allocation4]  }
   0x4   : > { %p236_p2 = pnand %p1043_p0, %p235_p1 }
   0x6   : > { %p1133_p4 = pneg %p236_p2  ;;  %288 = sbr.rel (%p236_p2) target bundleno = 576 (0x240), region = 48 }
   0x8   : > { %p1134_p5 = pnand %p1137_p3, %p1133_p4 }
   0xa   : > { %1136 = dma.vmem_to_smem (!%p1134_p5), %s248_s13, 16, %s1250_s14, [#allocation5]  }
   0xb   : > { %1233 = dma.done.wait (%p1137_p3), [#allocation5], 16  }
   0xc   : > { %1235 = vsyncadd (%p1137_p3), [#allocation5], 4294967280 }
   0xd   : > { %295 = sfence }
   0xe   : > { %p332_p6 = scmp.lt.s32.totalorder %s1309_s10, 1  ;;  %s1108_s15 = sshll.u32 %s1309_s10, 7 }
   0xf   : > { %s1322_s18 = scalar_lea.vmem %s1742_s1, %s1108_s15 }
  0x10   : > { %s1325_s19 = scalar_select %p332_p6, %s1309_s10, 1  ;;  %v364_v0 = vld [vmem:[%s1322_s18] sm:$0xff]  ;;  %v366_v1 = vld [vmem:[%s1322_s18 + $0x8] sm:$0xff]  ;;  %v368_v2 = vld [vmem:[%s1322_s18 + $0x10] sm:$0xff] }
  0x11   : > { %365 = vst [vmem:[#allocation2] sm:$0xff] %v364_v0  ;;  %v370_v3 = vld [vmem:[%s1322_s18 + $0x18] sm:$0xff]  ;;  %v372_v4 = vld [vmem:[%s1322_s18 + $0x20] sm:$0xff]  ;;  %v374_v5 = vld [vmem:[%s1322_s18 + $0x28] sm:$0xff] }
  0x12   : > { %s1124_s20 = smul.u32 24, %s1325_s19  ;;  %s349_s23 = scalar_lea.vmem %s1750_s9, %s1325_s19  ;;  %367 = vst [vmem:[#allocation2 + $0x8] sm:$0xff] %v366_v1  ;;  %v376_v6 = vld [vmem:[%s1322_s18 + $0x30] sm:$0xff]  ;;  %v378_v7 = vld [vmem:[%s1322_s18 + $0x38] sm:$0xff]  ;;  %v380_v8 = vld [vmem:[%s1322_s18 + $0x40] sm:$0xff] }
  0x13   : > { %s1125_s24 = smul.u32 96, %s1325_s19  ;;  %369 = vst [vmem:[#allocation2 + $0x10] sm:$0xff] %v368_v2  ;;  %v382_v9 = vld [vmem:[%s1322_s18 + $0x48] sm:$0xff]  ;;  %v384_v10 = vld [vmem:[%s1322_s18 + $0x50] sm:$0xff]  ;;  %v386_v11 = vld [vmem:[%s1322_s18 + $0x58] sm:$0xff] }
  0x14   : > { %s1342_s27 = scalar_lea.vmem %s1743_s2, %s1124_s20  ;;  %s1126_s28 = smul.u32 48, %s1325_s19  ;;  %371 = vst [vmem:[#allocation2 + $0x18] sm:$0xff] %v370_v3  ;;  %v388_v12 = vld [vmem:[%s1322_s18 + $0x60] sm:$0xff]  ;;  %v390_v13 = vld [vmem:[%s1322_s18 + $0x68] sm:$0xff]  ;;  %v392_v14 = vld [vmem:[%s1322_s18 + $0x70] sm:$0xff] }
  0x15   : > { %s1349_s12 = scalar_lea.vmem %s1744_s3, %s1125_s24  ;;  %373 = vst [vmem:[#allocation2 + $0x20] sm:$0xff] %v372_v4  ;;  %v394_v15 = vld [vmem:[%s1322_s18 + $0x78] sm:$0xff] }
  0x16   : > { %s1355_s15 = scalar_lea.vmem %s1749_s8, %s1126_s28  ;;  %375 = vst [vmem:[#allocation2 + $0x28] sm:$0xff] %v374_v5 }
  0x17   : > { %377 = vst [vmem:[#allocation2 + $0x30] sm:$0xff] %v376_v6 }
  0x18   : > { %379 = vst [vmem:[#allocation2 + $0x38] sm:$0xff] %v378_v7 }
  0x19   : > { %381 = vst [vmem:[#allocation2 + $0x40] sm:$0xff] %v380_v8 }
  0x1a   : > { %383 = vst [vmem:[#allocation2 + $0x48] sm:$0xff] %v382_v9 }
  0x1b   : > { %385 = vst [vmem:[#allocation2 + $0x50] sm:$0xff] %v384_v10 }
  0x1c   : > { %387 = vst [vmem:[#allocation2 + $0x58] sm:$0xff] %v386_v11 }
  0x1d   : > { %389 = vst [vmem:[#allocation2 + $0x60] sm:$0xff] %v388_v12 }
  0x1e   : > { %391 = vst [vmem:[#allocation2 + $0x68] sm:$0xff] %v390_v13 }
  0x1f   : > { %393 = vst [vmem:[#allocation2 + $0x70] sm:$0xff] %v392_v14 }
  0x20   : > { %395 = vst [vmem:[#allocation2 + $0x78] sm:$0xff] %v394_v15 }
  0x21   : > { %401 = vsyncadd [#allocation3], 2048 }
  0x22   : > { %1236 = dma.done.wait [#allocation3], 2048 }
  0x23   : > { %1237 = vsyncadd [#allocation3], 4294965248  ;;  %v1368_v16 = vld [vmem:[%s1745_s4] sm:$0xf]  ;;  %v1373_v17 = vld [vmem:[%s1745_s4] sm:$0xf0] }
  0x24   : > { %1752 = vst [vmem:[#allocation9_spill] sm:$0xff] %v1368_v16  ;;  %v1378_v18 = vld [vmem:[%s1745_s4 + $0x8] sm:$0xf]  ;;  %v1383_v19 = vld [vmem:[%s1745_s4 + $0x8] sm:$0xf0]  ;;  %v1413_v25 = vld [vmem:[%s1748_s7] sm:$0xff] }
  0x25   : > { %1753 = vst [vmem:[#allocation10_spill] sm:$0xff] %v1373_v17  ;;  %v1388_v20 = vld [vmem:[%s1746_s5] sm:$0xf]  ;;  %v1393_v21 = vld [vmem:[%s1746_s5] sm:$0xf0]  ;;  %s1415_s18 = smov 0.0  }
  0x26   : > { %v1398_v22 = vld [vmem:[%s1746_s5 + $0x8] sm:$0xf]  ;;  %v1403_v23 = vld [vmem:[%s1746_s5 + $0x8] sm:$0xf0]  ;;  %v1408_v24 = vld [vmem:[%s1747_s6] sm:$0xf] }
  0x27   : > { %s1417_s25 = smov 0  }
  0x28 LB: >> { %s423_s26 = smul.u32 3, %s1309_s10  ;;  %s1427_s28 = sshll.u32 %s1248_s25, 3  ;;  %v1251_v26 = vmov 0   ;;  %vm1751_vm0 = vcmask 261120   ;;  %vm491_vm1 = vcmask 1043456   ;;  %v1065_v57 = vor.u32 %v1393_v21, %v1388_v20  ;;  %s1248_s25 = sphi %s1417_s25, %s421_s25   ;;  %s1244_s18 = sphi %s1415_s18, %s1788_s18  }
  0x29   : >> { %s1118_s29 = sadd.s32 8, %s1427_s28  ;;  %1167 = vset.pattern.permute.xlu1 %v1251_v26  ;;  %1166 = vset.pattern.permute.xlu0 %v1251_v26  ;;  %s1114_s20 = sadd.s32 40, %s1427_s28  ;;  %vm484_vm2 = vcmask 64512   ;;  %v1081_v59 = vor.u32 %v1383_v19, %v1378_v18  ;;  %v1069_v60 = vor.u32 %v1403_v23, %v1398_v22 }
  0x2a   : >> { %s452_s11 = sshra.s32 %s1118_s29, 3  ;;  %s424_s13 = sadd.s32 %s1248_s25, %s423_s26  ;;  %1168 = vset.pattern.permute.xlu2 %v1251_v26 }
  0x2b   : >> { %s1119_s14 = sshll.u32 %s452_s11, 4  ;;  %791 = vperm.xlu2 %1168, %v1413_v25   ;;  %s1432_s17 = sshll.u32 %s424_s13, 2  ;;  %v1754_v16 = vld [vmem:[#allocation9_spill] sm:$0xff] }
  0x2c   : >> { %s456_s16 = scalar_lea.vmem [#allocation2], %s1119_s14  ;;  %s1436_s21 = sld [smem:[#allocation4 + %s1432_s17]]  ;;  %v1755_v17 = vld [vmem:[#allocation10_spill] sm:$0xff] }
  0x2d   : >> { %v461_v27 = vld [vmem:[%s456_s16 + $0x20] sm:$0xff]  ;;  %v463_v28 = vld [vmem:[%s456_s16 + $0x30] sm:$0xff]  ;;  %v462_v29 = vld [vmem:[%s456_s16 + $0x28] sm:$0xff]  ;;  %s435_s22 = sshra.s32 %s1114_s20, 3  ;;  %s444_s26 = scalar_lea.vmem %s1342_s27, %s1427_s28  ;;  %v1077_v44 = vor.u32 %v1755_v17, %v1754_v16 }
  0x2e   : >> { %v467_v30 = vpack.c.bf16 %v463_v28, %v461_v27  ;;  %v464_v31 = vld [vmem:[%s456_s16 + $0x38] sm:$0xff]  ;;  %v457_v32 = vld [vmem:[%s456_s16] sm:$0xff]  ;;  %v459_v33 = vld [vmem:[%s456_s16 + $0x10] sm:$0xff]  ;;  %s1115_s24 = sshll.u32 %s435_s22, 4  ;;  %s1086_s29 = sshll.u32 %s1248_s25, 5 }
  0x2f   : >> { %v468_v34 = vpack.c.bf16 %v464_v31, %v462_v29  ;;  %v458_v35 = vld [vmem:[%s456_s16 + $0x8] sm:$0xff]  ;;  %v460_v36 = vld [vmem:[%s456_s16 + $0x18] sm:$0xff]  ;;  %v465_v37 = vpack.c.bf16 %v459_v33, %v457_v32  ;;  %v445_v39 = vld [vmem:[%s444_s26] sm:$0xff]  ;;  %s439_s11 = scalar_lea.vmem [#allocation2], %s1115_s24  ;;  %s592_s13 = scalar_lea.vmem %s1349_s12, %s1086_s29 }
  0x30   : >> { %559 = vmatpush.bf16.msra.mxu2 %v467_v30  ;;  %v466_v38 = vpack.c.bf16 %v460_v36, %v458_v35  ;;  %v1441_v40 = vld [vmem:[%s439_s11] sm:$0xff]  ;;  %v446_v41 = vunpack.c.l.bf16 %v445_v39  ;;  %v1443_v42 = vld [vmem:[%s439_s11 + $0x8] sm:$0xff]  ;;  %v447_v43 = vunpack.c.h.bf16 %v445_v39  ;;  %v595_v47 = vld [vmem:[%s592_s13 + $0x10] sm:$0xff]  ;;  %s429_s14 = sadd.s32 2, %s1432_s17  ;;  %s427_s20 = sadd.s32 1, %s1432_s17 }
  0x31   : >> { %578 = vmatpush.bf16.msra.mxu3 %v468_v34  ;;  %v593_v46 = vld [vmem:[%s592_s13] sm:$0xff]  ;;  %609 = vperm.xlu0 %1166, %v595_v47   ;;  %v594_v54 = vld [vmem:[%s592_s13 + $0x8] sm:$0xff]  ;;  %v596_v58 = vld [vmem:[%s592_s13 + $0x18] sm:$0xff]  ;;  %s430_s16 = sld [smem:[#allocation4 + %s429_s14]]  ;;  %s1121_s22 = sadd.s32 32, %s1427_s28 }
  0x32   : >> { %v469_v45 = vstv %s1436_s21  ;;  %v1450_v48 = vadd.f32 %v446_v41, %v1441_v40  ;;  %v1453_v49 = vadd.f32 %v447_v43, %v1443_v42  ;;  %599 = vperm.xlu1 %1167, %v593_v46   ;;  %s428_s21 = sld [smem:[#allocation4 + %s427_s20]]  ;;  %s892_s24 = sshra.s32 %s1121_s22, 3 }
  0x33   : >> { %s1122_s26 = sshll.u32 %s892_s24, 4  ;;  %s1123_s29 = sshll.u32 %s1248_s25, 4 }
  0x34   : >> { %560 = vmatpush.bf16.msra.mxu2 %v465_v37  ;;  %v470_v50 = vmul.f32 %v469_v45, %v1450_v48  ;;  %v471_v51 = vmul.f32 %v469_v45, %v1453_v49  ;;  %s900_s28 = scalar_lea.vmem %s1355_s15, %s1123_s29  ;;  %s896_s11 = scalar_lea.vmem [#allocation2], %s1122_s26 }
  0x35   : >> { %579 = vmatpush.bf16.msra.mxu3 %v466_v38  ;;  %s431_s13 = sadd.s32 3, %s1432_s17  ;;  %s421_s25 = sadd.s32 1, %s1248_s25  }
  0x36   : >> { %v472_v52 = vpack.c.bf16 %v470_v50, %v470_v50  ;;  %v473_v53 = vpack.c.bf16 %v471_v51, %v471_v51  ;;  %s432_s14 = sld [smem:[#allocation4 + %s431_s13]]  ;;  %p418_p7 = scmp.ge.s32.totalorder %s421_s25, 3  }
  0x37   : >> { %1082 = vmatmul.msk.bf16.vlgmr.msra.gmra.mxu2 %vm1751_vm0, %v1077_v44  ;;  %v828_v17 = vstv %s430_s16 }
  0x38   : >> { %1084 = vmatmul.msk.bf16.vlgmr.msra.gmra.mxu3 %vm1751_vm0, %v1077_v44  ;;  %v493_v55 = vsel %vm491_vm1, %v472_v52, 0  ;;  %v496_v56 = vsel %vm491_vm1, %v473_v53, 0 }
  0x39   : >> { %505 = vmatpush.bf16.msra.mxu0 %v493_v55  ;;  %524 = vmatpush.bf16.msra.mxu1 %v496_v56 }
  0x3a   : >> { %604 = vperm.xlu1 %1167, %v594_v54   ;;  %614 = vperm.xlu0 %1166, %v596_v58  }
  0x3c   : >> { %1070 = vmatmul.msk.bf16.vlgmr.msra.gmra.mxu0 %vm484_vm2, %v1065_v57  ;;  %1072 = vmatmul.msk.bf16.vlgmr.msra.gmra.mxu1 %vm484_vm2, %v1065_v57 }
  0x47   : >> { %1083 = vmatmul.msk.bf16.gmra.mxu2 %vm1751_vm0, %v1081_v59 }
  0x48   : >> { %1085 = vmatmul.msk.bf16.gmra.mxu3 %vm1751_vm0, %v1081_v59 }
  0x4c   : >> { %1071 = vmatmul.msk.bf16.gmra.mxu0 %vm484_vm2, %v1069_v60  ;;  %1073 = vmatmul.msk.bf16.gmra.mxu1 %vm484_vm2, %v1069_v60 }
  0xa3   : >> { %v610_v34 = vpop.permute.xlu0 %609 }
  0xa4   : >> { %v600_v61 = vpop.permute.xlu1 %599 }
  0xac   : >> { %v605_v9 = vpop.permute.xlu1 %604  ;;  %v615_v58 = vpop.permute.xlu0 %614 }
  0xb9   : >> { %v507_v0 = vpop.f32.mrf.mxu0  ;;  %v526_v1 = vpop.f32.mrf.mxu1 }
  0xba   : >> { %v562_v62 = vpop.f32.mrf.mxu2 }
  0xbb   : >> { %v581_v63 = vpop.f32.mrf.mxu3  ;;  %v563_v2 = vadd.f32 %v562_v62, %v507_v0 }
  0xbc   : >> { %v582_v3 = vadd.f32 %v581_v63, %v526_v1 }
  0xbd   : >> { %v1467_v4 = vadd.f32 %v600_v61, %v563_v2 }
  0xbe   : >> { %v1470_v7 = vadd.f32 %v600_v61, %v582_v3 }
  0xbf   : >> { %v1087_v5 = vmul.f32 -1.442695, %v1467_v4 }
  0xc0   : >> { %v1088_v14 = vmul.f32 -1.442695, %v1470_v7 }
  0xc1   : >> { %v509_v10 = vpop.f32.mrf.mxu0  ;;  %v528_v11 = vpop.f32.mrf.mxu1  ;;  %1169 = vpow2.f32 %v1087_v5 }
  0xc2   : >> { %v564_v6 = vpop.f32.mrf.mxu2  ;;  %1171 = vpow2.f32 %v1088_v14 }
  0xc3   : >> { %v583_v8 = vpop.f32.mrf.mxu3  ;;  %v565_v12 = vadd.f32 %v564_v6, %v509_v10 }
  0xc4   : >> { %v584_v13 = vadd.f32 %v583_v8, %v528_v11 }
  0xc5   : >> { %v1473_v15 = vadd.f32 %v605_v9, %v565_v12 }
  0xc6   : >> { %v1475_v26 = vadd.f32 %v605_v9, %v584_v13 }
  0xc7   : >> { %v1089_v27 = vmul.f32 -1.442695, %v1473_v15  ;;  %v1170_v30 = vpop.eup %1169 }
  0xc8   : >> { %v1090_v28 = vmul.f32 -1.442695, %v1475_v26  ;;  %v1479_v37 = vadd.f32 1.0, %v1170_v30  ;;  %v1172_v41 = vpop.eup %1171 }
  0xc9   : >> { %1173 = vpow2.f32 %v1089_v27  ;;  %v512_v32 = vpop.f32.mrf.mxu0  ;;  %v531_v33 = vpop.f32.mrf.mxu1  ;;  %v1488_v51 = vadd.f32 1.0, %v1172_v41 }
  0xca   : >> { %v567_v29 = vpop.f32.mrf.mxu2  ;;  %1175 = vpow2.f32 %v1090_v28  ;;  %v668_v10 = vand.u32 2147483648, %v1479_v37  ;;  %vm662_vm3 = vweird.f32 %v1479_v37 }
  0xcb   : >> { %v586_v31 = vpop.f32.mrf.mxu3  ;;  %v568_v35 = vadd.f32 %v567_v29, %v512_v32  ;;  %1177 = vrcp.f32 %v1479_v37  ;;  %vm677_vm4 = vweird.f32 %v1488_v51  ;;  %v1774_v16 = vand.u32 2147483647, %v1488_v51 }
  0xcc   : >> { %v587_v36 = vadd.f32 %v586_v31, %v531_v33  ;;  %v666_v31 = vand.u32 2147483647, %v1479_v37 }
  0xcd   : >> { %v1481_v38 = vadd.f32 %v610_v34, %v568_v35  ;;  %v1538_v35 = vor.u32 1.1754944e-38, %v668_v10 }
  0xce   : >> { %v1483_v39 = vadd.f32 %v610_v34, %v587_v36  ;;  %vm1610_vm0 = vcmp.eq.f32.partialorder %v666_v31, 8.507059e+37 }
  0xcf   : >> { %v1091_v43 = vmul.f32 -1.442695, %v1481_v38  ;;  %v1174_v45 = vpop.eup %1173 }
  0xd0   : >> { %v1092_v44 = vmul.f32 -1.442695, %v1483_v39  ;;  %v1176_v50 = vpop.eup %1175  ;;  %v1490_v54 = vadd.f32 1.0, %v1174_v45 }
  0xd1   : >> { %1179 = vpow2.f32 %v1091_v43  ;;  %v514_v52 = vpop.f32.mrf.mxu0  ;;  %v533_v53 = vpop.f32.mrf.mxu1  ;;  %v1492_v57 = vadd.f32 1.0, %v1176_v50 }
  0xd2   : >> { %v569_v46 = vpop.f32.mrf.mxu2  ;;  %1181 = vpow2.f32 %v1092_v44  ;;  %v1494_v59 = vpop.eup %1177  ;;  %v698_v28 = vand.u32 2147483648, %v1490_v54  ;;  %vm692_vm6 = vweird.f32 %v1490_v54 }
  0xd3   : >> { %v588_v47 = vpop.f32.mrf.mxu3  ;;  %v570_v55 = vadd.f32 %v569_v46, %v514_v52  ;;  %1183 = vrcp.f32 %v1488_v51  ;;  %v658_v3 = vmul.f32 %v1494_v59, %v1479_v37  ;;  %v713_v43 = vand.u32 2147483648, %v1492_v57 }
  0xd4   : >> { %v589_v56 = vadd.f32 %v588_v47, %v533_v53  ;;  %1185 = vrcp.f32 %v1490_v54  ;;  %v696_v53 = vand.u32 2147483647, %v1490_v54  ;;  %vm663_vm5 = vweird.f32 %v1494_v59 }
  0xd5   : >> { %v1497_v60 = vadd.f32 %v615_v58, %v570_v55  ;;  %1187 = vrcp.f32 %v1492_v57  ;;  %v659_v9 = vsub.f32 1.0, %v658_v3  ;;  %v1550_v55 = vor.u32 1.1754944e-38, %v698_v28  ;;  %vm1569_vm8 = vmor %vm662_vm3, %vm663_vm5 }
  0xd6   : >> { %v1499_v61 = vadd.f32 %v615_v58, %v589_v56  ;;  %vm1589_vm14 = vcmp.eq.f32.partialorder %v696_v53, 8.507059e+37 }
  0xd7   : >> { %v1180_v62 = vpop.eup %1179  ;;  %v1093_v0 = vmul.f32 -1.442695, %v1497_v60  ;;  %v660_v30 = vmul.f32 %v1494_v59, %v659_v9 }
  0xd8   : >> { %v1502_v63 = vadd.f32 1.0, %v1180_v62  ;;  %v1182_v1 = vpop.eup %1181  ;;  %v1094_v2 = vmul.f32 -1.442695, %v1499_v61 }
  0xd9   : >> { %v1510_v5 = vadd.f32 1.0, %v1182_v1  ;;  %v1512_v6 = vpop.eup %1183  ;;  %v1553_v56 = vadd.f32 %v1494_v59, %v660_v30  ;;  %v711_v1 = vand.u32 2147483647, %v1492_v57 }
  0xda   : >> { %1189 = vrcp.f32 %v1502_v63  ;;  %v1515_v8 = vpop.eup %1185  ;;  %v673_v14 = vmul.f32 %v1512_v6, %v1488_v51  ;;  %v726_v62 = vand.u32 2147483647, %v1502_v63  ;;  %v728_v9 = vand.u32 2147483648, %v1502_v63 }
  0xdb   : >> { %1191 = vpow2.f32 %v1093_v0  ;;  %v1518_v11 = vpop.eup %1187  ;;  %v688_v13 = vmul.f32 %v1515_v8, %v1490_v54  ;;  %vm678_vm9 = vweird.f32 %v1512_v6  ;;  %vm693_vm10 = vweird.f32 %v1515_v8 }
  0xdc   : >> { %1193 = vrcp.f32 %v1510_v5  ;;  %v703_v33 = vmul.f32 %v1518_v11, %v1492_v57  ;;  %v674_v52 = vsub.f32 1.0, %v673_v14  ;;  %vm722_vm11 = vweird.f32 %v1502_v63  ;;  %vm1618_vm7 = vmor %vm677_vm4, %vm678_vm9 }
  0xdd   : >> { %1195 = vpow2.f32 %v1094_v2  ;;  %v689_v47 = vsub.f32 1.0, %v688_v13  ;;  %v1560_v2 = vor.u32 1.1754944e-38, %v713_v43  ;;  %v741_v13 = vand.u32 2147483647, %v1510_v5  ;;  %vm1637_vm4 = vmor %vm692_vm6, %vm693_vm10 }
  0xde   : >> { %v704_v58 = vsub.f32 1.0, %v703_v33  ;;  %vm1584_vm13 = vcmp.eq.f32.partialorder %v726_v62, 8.507059e+37  ;;  %vm737_vm1 = vweird.f32 %v1510_v5  ;;  %vm1603_vm3 = vcmp.eq.f32.partialorder %v711_v1, 8.507059e+37 }
  0xdf   : >> { %v690_v10 = vmul.f32 %v1515_v8, %v689_v47  ;;  %vm1598_vm2 = vcmp.eq.f32.partialorder %v741_v13, 8.507059e+37  ;;  %v1252_v1 = vmov 255.0  }
  0xe0   : >> { %v1520_v12 = vpop.eup %1189  ;;  %v705_v30 = vmul.f32 %v1518_v11, %v704_v58 }
  0xe1   : >> { %v1192_v27 = vpop.eup %1191  ;;  %v718_v29 = vmul.f32 %v1520_v12, %v1502_v63  ;;  %vm723_vm15 = vweird.f32 %v1520_v12  ;;  %v691_v58 = vadd.f32 %v1515_v8, %v690_v10  ;;  %v840_v10 = vand.u32 2147483648, %v828_v17 }
  0xe2   : >> { %v1532_v32 = vpop.eup %1193  ;;  %v1536_v34 = vadd.f32 1.0, %v1192_v27  ;;  %v675_v27 = vmul.f32 %v1512_v6, %v674_v52  ;;  %v706_v13 = vadd.f32 %v1518_v11, %v705_v30  ;;  %vm1627_vm12 = vmor %vm722_vm11, %vm723_vm15  ;;  %vm1646_vm11 = vcmp.eq.f32.partialorder %v1774_v16, 8.507059e+37 }
  0xe3   : >> { %v1196_v41 = vpop.eup %1195  ;;  %v719_v44 = vsub.f32 1.0, %v718_v29  ;;  %v733_v45 = vmul.f32 %v1532_v32, %v1510_v5  ;;  %vm738_vm5 = vweird.f32 %v1532_v32  ;;  %v695_v54 = vsel %vm1637_vm4, %v1515_v8, %v691_v58 }
  0xe4   : >> { %1197 = vrcp.f32 %v1536_v34  ;;  %v1546_v50 = vadd.f32 1.0, %v1196_v41  ;;  %v743_v41 = vand.u32 2147483648, %v1510_v5  ;;  %v676_v53 = vadd.f32 %v1512_v6, %v675_v27  ;;  %vm1658_vm10 = vmor %vm737_vm1, %vm738_vm5 }
  0xe5   : >> { %v734_v0 = vsub.f32 1.0, %v733_v45  ;;  %v720_v3 = vmul.f32 %v1520_v12, %v719_v44  ;;  %v729_v45 = vor.u32 1.1754944e-38, %v728_v9  ;;  %v756_v31 = vand.u32 2147483647, %v1536_v34 }
  0xe6   : >> { %1199 = vrcp.f32 %v1546_v50  ;;  %vm752_vm6 = vweird.f32 %v1536_v34  ;;  %v773_v16 = vand.u32 2147483648, %v1546_v50  ;;  %vm1780_vm15 = vweird.f32 %v1492_v57 }
  0xe7   : >> { %v735_v28 = vmul.f32 %v1532_v32, %v734_v0  ;;  %v721_v44 = vadd.f32 %v1520_v12, %v720_v3  ;;  %v680_v58 = vsel %vm1618_vm7, %v1512_v6, %v676_v53  ;;  %1201 = vrcp.f32 %v828_v17 }
  0xe8   : >> { %v774_v33 = vor.u32 1.1754944e-38, %v773_v16  ;;  %1203 = vrcp.f32 %v1252_v1 }
  0xe9   : >> { %v736_v9 = vadd.f32 %v1532_v32, %v735_v28  ;;  %v758_v28 = vand.u32 2147483648, %v1536_v34  ;;  %v725_v63 = vsel %vm1627_vm12, %v1520_v12, %v721_v44  ;;  %vm1779_vm12 = vweird.f32 %v1518_v11 }
  0xea   : >> { %v1198_v37 = vpop.eup %1197  ;;  %vm1668_vm9 = vmor %vm1780_vm15, %vm1779_vm12  ;;  %v730_v44 = vsel %vm1584_vm13, %v729_v45, %v725_v63  ;;  %vm757_vm12 = vcmp.eq.f32.partialorder %v756_v31, 8.507059e+37  ;;  %v838_v31 = vand.u32 2147483647, %v828_v17 }
  0xeb   : >> { %v748_v47 = vmul.f32 %v1198_v37, %v1536_v34  ;;  %v740_v5 = vsel %vm1658_vm10, %v1532_v32, %v736_v9  ;;  %vm1783_vm5 = vweird.f32 %v1198_v37  ;;  %v759_v57 = vor.u32 1.1754944e-38, %v758_v28 }
  0xec   : >> { %v1200_v52 = vpop.eup %1199  ;;  %vm754_vm4 = vmor %vm752_vm6, %vm1783_vm5  ;;  %vm767_vm10 = vweird.f32 %v1546_v50  ;;  %v700_v32 = vsel %vm1589_vm14, %v1550_v55, %v695_v54  ;;  %v781_v45 = vmul.f32 %v730_v44, %v1481_v38  ;;  %v1784_v55 = vsel %vm1569_vm8, %v1494_v59, %v1553_v56 }
  0xed   : >> { %v749_v3 = vsub.f32 1.0, %v748_v47  ;;  %v763_v46 = vmul.f32 %v1200_v52, %v1546_v50  ;;  %v744_v47 = vor.u32 1.1754944e-38, %v743_v41  ;;  %vm768_vm1 = vweird.f32 %v1200_v52 }
  0xee   : >> { %v710_v41 = vsel %vm1668_vm9, %v1518_v11, %v706_v13  ;;  %vm769_vm13 = vmor %vm767_vm10, %vm768_vm1  ;;  %v670_v43 = vsel %vm1610_vm0, %v1538_v35, %v1784_v55  ;;  %v1785_v38 = vand.u32 2147483648, %v1488_v51  ;;  %vm1786_vm0 = vcmask 261120  }
  0xef   : >> { %v750_v30 = vmul.f32 %v1198_v37, %v749_v3  ;;  %v764_v36 = vsub.f32 1.0, %v763_v46  ;;  %v771_v46 = vand.u32 2147483647, %v1546_v50  ;;  %v715_v50 = vsel %vm1603_vm3, %v1560_v2, %v710_v41  ;;  %vm1787_vm8 = vmmov %vm1786_vm0 }
  0xf0   : >> { %v684_v62 = vor.u32 1.1754944e-38, %v1785_v38  ;;  %v780_v59 = vmul.f32 %v715_v50, %v1475_v26  ;;  %v777_v35 = vmul.f32 %v670_v43, %v1467_v4  ;;  %v1202_v26 = vpop.eup %1201  ;;  %vm834_vm14 = vweird.f32 %v828_v17 }
  0xf1   : >> { %v751_v34 = vadd.f32 %v1198_v37, %v750_v30  ;;  %v765_v29 = vmul.f32 %v1200_v52, %v764_v36  ;;  %v745_v36 = vsel %vm1598_vm2, %v744_v47, %v740_v5  ;;  %vm772_vm7 = vcmp.eq.f32.partialorder %v771_v46, 8.507059e+37  ;;  %v1204_v54 = vpop.eup %1203 }
  0xf2   : >> { %v782_v53 = vmul.f32 %v745_v36, %v1483_v39  ;;  %v685_v14 = vsel %vm1646_vm11, %v684_v62, %v680_v58  ;;  %v830_v4 = vmul.f32 %v1202_v26, %v828_v17  ;;  %vm835_vm2 = vweird.f32 %v1202_v26 }
  0xf3   : >> { %v755_v3 = vsel %vm754_vm4, %v1198_v37, %v751_v34  ;;  %v766_v27 = vadd.f32 %v1200_v52, %v765_v29  ;;  %vm836_vm3 = vmor %vm834_vm14, %vm835_vm2  ;;  %v841_v47 = vor.u32 1.1754944e-38, %v840_v10  ;;  %vm839_vm9 = vcmp.eq.f32.partialorder %v838_v31, 8.507059e+37  ;;  %v792_v34 = vpop.permute.xlu2 %791 }
  0xf4   : >> { %v760_v11 = vsel %vm757_vm12, %v759_v57, %v755_v3  ;;  %v831_v39 = vsub.f32 1.0, %v830_v4  ;;  %v878_v8 = vmul.f32 255.0, %v1204_v54  ;;  %vm882_vm11 = vweird.f32 %v1204_v54 }
  0xf5   : >> { %v783_v9 = vmul.f32 %v760_v11, %v1497_v60  ;;  %v770_v6 = vsel %vm769_vm13, %v1200_v52, %v766_v27  ;;  %v779_v60 = vmul.f32 %v700_v32, %v1473_v15  ;;  %v778_v15 = vmul.f32 %v685_v14, %v1470_v7 }
  0xf6   : >> { %v775_v37 = vsel %vm772_vm7, %v774_v33, %v770_v6  ;;  %v823_v7 = vstv %s428_s21  ;;  %v879_v58 = vsub.f32 1.0, %v878_v8 }
  0xf7   : >> { %v787_v52 = vpack.c.bf16 %v783_v9, %v781_v45  ;;  %v784_v2 = vmul.f32 %v775_v37, %v1499_v61  ;;  %v785_v51 = vpack.c.bf16 %v779_v60, %v777_v35  ;;  %v786_v0 = vpack.c.bf16 %v780_v59, %v778_v15 }
  0xf8   : >> { %v832_v61 = vmul.f32 %v1202_v26, %v831_v39  ;;  %v824_v28 = vmul.f32 %v823_v7, %v1450_v48  ;;  %v825_v63 = vmul.f32 %v823_v7, %v1453_v49 }
  0xf9   : >> { %803 = vmatpush.bf16.msrb.mxu0 %v787_v52  ;;  %v788_v56 = vpack.c.bf16 %v784_v2, %v782_v53 }
  0xfa   : >> { %v833_v13 = vadd.f32 %v1202_v26, %v832_v61  ;;  %v826_v12 = vsub.f32 %v1441_v40, %v824_v28  ;;  %v827_v16 = vsub.f32 %v1443_v42, %v825_v63  ;;  %v880_v40 = vmul.f32 %v1204_v54, %v879_v58 }
  0xfb   : >> { %816 = vmatpush.bf16.msrb.mxu1 %v788_v56 }
  0xfc   : >> { %v837_v30 = vsel %vm836_vm3, %v1202_v26, %v833_v13  ;;  %v881_v55 = vadd.f32 %v1204_v54, %v880_v40 }
  0xfd   : >> { %804 = vmatpush.bf16.msrb.mxu0 %v785_v51  ;;  %v842_v46 = vsel %vm839_vm9, %v841_v47, %v837_v30 }
  0xfe   : >> { %v843_v5 = vmul.f32 %v842_v46, %v826_v12  ;;  %v844_v44 = vmul.f32 %v842_v46, %v827_v16  ;;  %v883_v53 = vsel %vm882_vm11, %v1204_v54, %v881_v55 }
  0xff   : >> { %817 = vmatpush.bf16.msrb.mxu1 %v786_v0 }
 0x100   : >> { %1095 = vmatmul.msk.bf16.vlgmr.msrb.gmra.mxu0 %vm1786_vm0, %v1408_v24 }
 0x102   : >> { %1096 = vmatmul.msk.bf16.vlgmr.msrb.gmra.mxu1 %vm1787_vm8, %v1408_v24 }
 0x17d   : >> { %v806_v29 = vpop.f32.mrf.mxu0 }
 0x17e   : >> { %v807_v41 = vadd.f32 %v806_v29, %v792_v34 }
 0x17f   : >> { %v819_v57 = vpop.f32.mrf.mxu1 }
 0x180   : >> { %v820_v48 = vadd.f32 %v819_v57, %v792_v34  ;;  %v845_v3 = vsub.f32 %v807_v41, %v843_v5  ;;  %v861_v49 = vmul.f32 %v828_v17, %v807_v41 }
 0x182   : >> { %v846_v27 = vsub.f32 %v820_v48, %v844_v44  ;;  %v862_v32 = vmul.f32 %v828_v17, %v820_v48  ;;  %v863_v11 = vadd.f32 %v861_v49, %v824_v28  ;;  %v847_v36 = vmul.f32 %v845_v3, %v845_v3 }
 0x184   : >> { %v864_v33 = vadd.f32 %v862_v32, %v825_v63  ;;  %v1097_v45 = vclamps-f32 %v863_v11, 1.0  ;;  %v848_v42 = vmul.f32 %v846_v27, %v846_v27 }
 0x185   : >> { %v808_v9 = vpop.f32.mrf.mxu0 }
 0x186   : >> { %v1098_v6 = vclamps-f32 %v864_v33, 1.0  ;;  %v869_v50 = vadd.f32 1.0, %v1097_v45  ;;  %v849_v37 = vadd.f32 %v848_v42, %v847_v36 }
 0x187   : >> { %v821_v43 = vpop.f32.mrf.mxu1 }
 0x188   : >> { %v870_v38 = vadd.f32 1.0, %v1098_v6  ;;  %v871_v62 = vmul.f32 0.5, %v869_v50  ;;  %850 = vadd.xlane.f32.xlu2 %v849_v37 }
 0x18a   : >> { %v872_v60 = vmul.f32 0.5, %v870_v38  ;;  %v873_v52 = vmul.f32 255.0, %v871_v62 }
 0x18c   : >> { %v874_v2 = vmul.f32 255.0, %v872_v60  ;;  %v875_v14 = vfloor.f32 %v873_v52 }
 0x18e   : >> { %v876_v59 = vfloor.f32 %v874_v2  ;;  %v884_v56 = vmul.f32 %v883_v53, %v875_v14 }
 0x190   : >> { %v885_v35 = vmul.f32 %v883_v53, %v876_v59  ;;  %v886_v51 = vmul.f32 2.0, %v884_v56 }
 0x192   : >> { %v887_v15 = vmul.f32 2.0, %v885_v35  ;;  %v1099_v0 = vadd.f32 -1.0, %v886_v51 }
 0x194   : >> { %v1100_v17 = vadd.f32 -1.0, %v887_v15  ;;  %897 = vst [vmem:[%s896_s11] sm:$0xff] %v1099_v0 }
 0x195   : >> { %901 = vst [vmem:[%s900_s28] sm:$0xff] %v1099_v0 }
 0x196   : >> { %898 = vst [vmem:[%s896_s11 + $0x8] sm:$0xff] %v1100_v17 }
 0x197   : >> { %902 = vst [vmem:[%s900_s28 + $0x8] sm:$0xff] %v1100_v17 }
 0x1fb   : >> { %v851_v26 = vpop.xlane.xlu2 %850 }
 0x1fc   : >> { %v852_v4 = vrot.slane %v851_v26, 4 }
 0x1fe   : >> { %v853_v39 = vadd.f32 %v852_v4, %v851_v26 }
 0x200   : >> { %v854_v61 = vrot.slane %v853_v39, 2 }
 0x202   : >> { %v855_v7 = vadd.f32 %v854_v61, %v853_v39 }
 0x204   : >> { %v856_v10 = vrot.slane %v855_v7, 1 }
 0x206   : >> { %v857_v1 = vadd.f32 %v856_v10, %v855_v7 }
 0x208   : >> { %1127 = vpush %v857_v1 }
 0x239   : >> { %s1128_s16 = spop %1127 }
 0x23a   : >> { %s859_s20 = smul.f32 %s1128_s16, %s432_s14 }
 0x23b   : > { %420 = sbr.rel (!%p418_p7) target bundleno = 40 (0x28), region = 135 }
 0x23c   : >> { %s860_s21 = sadd.f32 %s1244_s18, %s859_s20  }
 0x23e   : >> { %s1788_s18 = smov %s860_s21  ;;  %v903_v13 = vstv (%p418_p7), %s860_s21 }
 0x23f   : > { %904 = vst [vmem:[%s349_s23] sm:$0x1] (%p418_p7), %v903_v13 }
 0x240 PF: > { %s21_s30 = sadd.s32 1, %s1240_s30  }
 0x241   : > { %p18_p8 = scmp.ge.s32.totalorder %s21_s30, 4  }
 0x243   :  { %20 = sbr.rel (!%p18_p8) target bundleno = 1 (0x1), region = 146 }
 0x248   :  { %938 = vsyncpa [#allocation5], 1 }
 0x249   :  { %940 = vsyncpa [#allocation5 + $0x1], 1 }
 0x24a   :  { %941 = vsyncmov [#allocation3] }
 0x24d   :  { %s942_s17 = vpop.sfrf %941 }
 0x24e   :  { %p1107_p9 = scmp.ne.s32.totalorder %s942_s17, 0 }
 0x250   :  { %946 = shalt.err (%p1107_p9)  }

</bundles_post_ra>
